<compile_context>
chip_gen: v7x
topology: tpu7x:2x2x1
jax: 0.10.0
libtpu: 0.0.40
codegen_flags: <defaults>
</compile_context>

<pallas_src>
import functools

import jax
import jax.numpy as jnp
import numpy as np
from jax import lax
from jax.experimental import pallas as pl
from jax.experimental.pallas import tpu as pltpu

EPS = 1e-5
LANE = 128


def _round_up(x, m):
    return (x + m - 1) // m * m


def _vmem_limit_bytes():
    """Generation-aware scoped-VMEM request (v7x: 64 MiB physical,
    v5e/v6e: 128 MiB).  Ask for at most half of physical, >= 16 MiB."""
    try:
        cap = int(pltpu.get_tpu_info().vmem_capacity_bytes)
    except Exception:
        cap = 128 << 20
    return int(max(16 << 20, min(cap // 2, 64 << 20)))


def _pick_tile(S, Cin, Cout, vmem_limit):
    """Pick the spatial tile (lane count) from a per-step VMEM byte budget.

    Per grid step (double-buffered): x block bf16 (2 bufs) + out block f32
    (2 bufs)  ->  (4*Cin + 8*Cout) bytes per spatial lane; the resident
    weight / scale / shift blocks are negligible.
    """
    per_lane = 4 * Cin + 8 * Cout
    budget = vmem_limit // 2                      # headroom for scratch etc.
    ts_cap = max(LANE, (budget // per_lane) // LANE * LANE)
    return min(_round_up(S, LANE), ts_cap)


def _conv_stats_kernel(x_ref, w_ref, stats_ref):
    """Per-(image, spatial-tile) BN partial statistics of the 1x1 conv output.

    x_ref: (1, Cin, TS) bf16, spatial on lanes.  w_ref: (Cout, Cin) bf16.
    The conv output is NOT written to HBM; lane-padding columns are exact
    zeros (no bias), so they contribute 0 to both sums.
    """
    y = jnp.dot(w_ref[...], x_ref[0],
                preferred_element_type=jnp.float32)          # (Cout, TS) f32
    psum = jnp.sum(y, axis=1, keepdims=True)                 # (Cout, 1)
    psq = jnp.sum(y * y, axis=1, keepdims=True)              # (Cout, 1)
    stats_ref[0, 0] = jnp.concatenate([psum, psq], axis=1)   # (Cout, 2)


def _conv_bn_apply_kernel(x_ref, w_ref, scale_ref, shift_ref, o_ref):
    """Recompute the 1x1 conv and apply the (pre-computed) BN scale/shift."""
    y = jnp.dot(w_ref[...], x_ref[0],
                preferred_element_type=jnp.float32)          # (Cout, TS) f32
    o_ref[0] = y * scale_ref[...] + shift_ref[...]


def conv_bn_forward(x_nchw, w_oihw, bias, gamma, beta, *, stride=1, padding=1):
    """Forward pass of conv_bn. x_nchw: (N, Cin, H, W) float32."""
    # The conv bias cancels exactly through training-mode BatchNorm
    # (mean absorbs it), so it is not plumbed into the kernels.
    del bias

    N, Cin, H, W = x_nchw.shape
    Cout = w_oihw.shape[0]

    # --- glue: zero-pad spatial (padding of the 1x1 conv), apply stride, then
    #     flatten each image to a lane-dense (Cin, S) slab (channels-first, no
    #     NCHW<->NHWC transposes).
    xp = jnp.pad(x_nchw, ((0, 0), (0, 0), (padding, padding), (padding, padding)))
    if stride != 1:
        xp = xp[:, :, ::stride, ::stride]
    OH, OW = xp.shape[2], xp.shape[3]
    S = OH * OW

    vmem_limit = _vmem_limit_bytes()
    TS = _pick_tile(S, Cin, Cout, vmem_limit)
    S_pad = _round_up(S, TS)
    n_s = S_pad // TS

    # bf16 feed for the MXU (halves activation DMA bytes); stats stay f32.
    x_flat = jnp.pad(xp.reshape(N, Cin, S),
                     ((0, 0), (0, 0), (0, S_pad - S))).astype(jnp.bfloat16)
    w2 = w_oihw.reshape(Cout, Cin).astype(jnp.bfloat16)      # 1x1 kernel -> matrix

    cparams = pltpu.CompilerParams(
        dimension_semantics=("parallel", "parallel"),
        vmem_limit_bytes=vmem_limit)

    # --- pass 1: per-(n, s) partial (sum, sumsq).  No conv-output round-trip,
    #     no in-kernel accumulation -> both grid axes megacore-parallel.
    stats = pl.pallas_call(
        _conv_stats_kernel,
        grid=(N, n_s),
        in_specs=[
            pl.BlockSpec((1, Cin, TS), lambda n, s: (n, 0, s)),
            pl.BlockSpec((Cout, Cin), lambda n, s: (0, 0)),
        ],
        out_specs=pl.BlockSpec((1, 1, Cout, 2), lambda n, s: (n, s, 0, 0)),
        out_shape=jax.ShapeDtypeStruct((N, n_s, Cout, 2), jnp.float32),
        compiler_params=cparams,
    )(x_flat, w2)

    # --- tiny XLA epilogue: global mean/var -> per-channel scale/shift
    #     (hoisted out of the per-tile apply kernel).
    tot = jnp.sum(stats, axis=(0, 1))                        # (Cout, 2)
    count = float(N * S)                                     # padded lanes add 0
    mean = tot[:, 0:1] / count                               # (Cout, 1)
    var = tot[:, 1:2] / count - mean * mean                  # biased (training-mode)
    inv = lax.rsqrt(var + EPS)
    scale = (gamma.reshape(Cout, 1) * inv).astype(jnp.float32)
    shift = (beta.reshape(Cout, 1) - mean * scale).astype(jnp.float32)

    # --- pass 2: recompute conv + fused BN apply (conv output never hits HBM).
    out_flat = pl.pallas_call(
        _conv_bn_apply_kernel,
        grid=(N, n_s),
        in_specs=[
            pl.BlockSpec((1, Cin, TS), lambda n, s: (n, 0, s)),
            pl.BlockSpec((Cout, Cin), lambda n, s: (0, 0)),
            pl.BlockSpec((Cout, 1), lambda n, s: (0, 0)),
            pl.BlockSpec((Cout, 1), lambda n, s: (0, 0)),
        ],
        out_specs=pl.BlockSpec((1, Cout, TS), lambda n, s: (n, 0, s)),
        out_shape=jax.ShapeDtypeStruct((N, Cout, S_pad), jnp.float32),
        compiler_params=cparams,
    )(x_flat, w2, scale, shift)

    # back to (N, Cout, OH, OW)
    return out_flat[:, :, :S].reshape(N, Cout, OH, OW)


def _reference(x, w, b, gamma, beta, *, stride=1, padding=1):
    """Pure-JAX reference with the module's semantics (training-mode BN)."""
    y = lax.conv_general_dilated(
        x, w, window_strides=(stride, stride),
        padding=((padding, padding), (padding, padding)),
        dimension_numbers=('NCHW', 'OIHW', 'NCHW'))
    y = y + b.reshape(1, -1, 1, 1)
    mean = jnp.mean(y, axis=(0, 2, 3), keepdims=True)
    var = jnp.mean((y - mean) ** 2, axis=(0, 2, 3), keepdims=True)
    y = (y - mean) * lax.rsqrt(var + EPS)
    return y * gamma.reshape(1, -1, 1, 1) + beta.reshape(1, -1, 1, 1)


if __name__ == "__main__":
    # Small shapes consistent with the module: N=2, in_ch=4, out_ch=8, 16x16.
    N, Cin, Cout, H, W = 2, 4, 8, 16, 16

    key = jax.random.PRNGKey(0)
    kx, kw, kb = jax.random.split(key, 3)

    x = jax.random.normal(kx, (N, Cin, H, W), dtype=jnp.float32)
    fan_in = Cin * 1 * 1
    w = jax.random.normal(kw, (Cout, Cin, 1, 1), dtype=jnp.float32) / np.sqrt(fan_in)
    b = jax.random.uniform(kb, (Cout,), dtype=jnp.float32,
                           minval=-1.0 / np.sqrt(fan_in), maxval=1.0 / np.sqrt(fan_in))
    gamma = jnp.ones((Cout,), jnp.float32)   # BatchNorm2d default weight
    beta = jnp.zeros((Cout,), jnp.float32)   # BatchNorm2d default bias

    out = conv_bn_forward(x, w, b, gamma, beta, stride=1, padding=1)
    out = jax.block_until_ready(out)
    assert out.shape == (N, Cout, H + 2, W + 2)

    # Tight check against a reference fed the same bf16-quantized conv operands
    # (isolates kernel correctness from the deliberate bf16 MXU feed).
    xq = x.astype(jnp.bfloat16).astype(jnp.float32)
    wq = w.astype(jnp.bfloat16).astype(jnp.float32)
    ref_q = _reference(xq, wq, b, gamma, beta, stride=1, padding=1)
    np.testing.assert_allclose(np.asarray(out), np.asarray(ref_q), rtol=2e-3, atol=2e-3)

    # Loose check against the full-f32 module semantics (bf16 feed ~1e-2 level).
    ref = _reference(x, w, b, gamma, beta, stride=1, padding=1)
    np.testing.assert_allclose(np.asarray(out), np.asarray(ref), rtol=5e-2, atol=5e-2)

    print("KERNEL_OK")
</pallas_src>

<mosaic_0001>
module attributes {stable_mosaic.version = 11 : i64} {
  func.func @_conv_stats_kernel(%arg0: i32, %arg1: i32, %arg2: memref<1x4x384xbf16, #tpu.memory_space<vmem>>, %arg3: memref<8x4xbf16, #tpu.memory_space<vmem>>, %arg4: memref<1x1x8x2xf32, #tpu.memory_space<vmem>>) attributes {dimension_semantics = [#tpu.dimension_semantics<parallel>, #tpu.dimension_semantics<parallel>], iteration_bounds = array<i64: 2, 1>, scalar_prefetch = 0 : i64, scratch_operands = 0 : i64, tpu.core_type = #tpu.core_type<tc>, window_params = [{transform_indices = @transform_0, window_bounds = array<i64: 1, 4, 384>}, {pipeline_mode = #tpu.pipeline_mode<synchronous>, transform_indices = @transform_1, window_bounds = array<i64: 8, 4>}, {transform_indices = @transform_2, window_bounds = array<i64: 1, 1, 8, 2>}]} {
    %c0 = arith.constant 0 : index
    %c0_0 = arith.constant 0 : index
    %0 = vector.load %arg3[%c0, %c0_0] : memref<8x4xbf16, #tpu.memory_space<vmem>>, vector<8x4xbf16>
    %c0_1 = arith.constant 0 : index
    %c0_2 = arith.constant 0 : index
    %c0_3 = arith.constant 0 : index
    %1 = vector.load %arg2[%c0_1, %c0_2, %c0_3] : memref<1x4x384xbf16, #tpu.memory_space<vmem>>, vector<1x4x384xbf16>
    %2 = vector.shape_cast %1 : vector<1x4x384xbf16> to vector<4x384xbf16>
    %cst = arith.constant dense<0.000000e+00> : vector<8x384xf32>
    %3 = tpu.matmul %0, %2, %cst {dimension_numbers = #tpu.dot_dimension_numbers<[1], [0], [0], [1], [0, 0, 1, 1], [], []>} : vector<8x4xbf16>, vector<4x384xbf16>, vector<8x384xf32> -> vector<8x384xf32>
    %cst_4 = arith.constant dense<0.000000e+00> : vector<8xf32>
    %4 = vector.multi_reduction <add>, %3, %cst_4 [1] : vector<8x384xf32> to vector<8xf32>
    %5 = vector.shape_cast %4 : vector<8xf32> to vector<8x1xf32>
    %6 = arith.mulf %3, %3 : vector<8x384xf32>
    %cst_5 = arith.constant dense<0.000000e+00> : vector<8xf32>
    %7 = vector.multi_reduction <add>, %6, %cst_5 [1] : vector<8x384xf32> to vector<8xf32>
    %8 = vector.shape_cast %7 : vector<8xf32> to vector<8x1xf32>
    %9 = tpu.concatenate %5, %8 in 1 : vector<8x1xf32>, vector<8x1xf32> -> vector<8x2xf32>
    %c0_6 = arith.constant 0 : index
    %c0_7 = arith.constant 0 : index
    %c0_8 = arith.constant 0 : index
    %c0_9 = arith.constant 0 : index
    %10 = vector.load %arg4[%c0_6, %c0_7, %c0_8, %c0_9] : memref<1x1x8x2xf32, #tpu.memory_space<vmem>>, vector<1x1x8x2xf32>
    %11 = vector.shape_cast %10 : vector<1x1x8x2xf32> to vector<8x2xf32>
    %12 = vector.shape_cast %9 : vector<8x2xf32> to vector<1x1x8x2xf32>
    tpu.vector_store %arg4[%c0_6, %c0_7, %c0_8, %c0_9], %12 {strides = array<i32>} : memref<1x1x8x2xf32, #tpu.memory_space<vmem>>, vector<1x1x8x2xf32>,
    return
  }
  func.func @transform_0(%arg0: i32, %arg1: i32) -> (i32, i32, i32) {
    %c0_i32 = arith.constant 0 : i32
    %c0_i32_0 = arith.constant 0 : i32
    return %arg0, %c0_i32, %arg1 : i32, i32, i32
  }
  func.func @transform_1(%arg0: i32, %arg1: i32) -> (i32, i32) {
    %c0_i32 = arith.constant 0 : i32
    %c0_i32_0 = arith.constant 0 : i32
    %c0_i32_1 = arith.constant 0 : i32
    return %c0_i32, %c0_i32_0 : i32, i32
  }
  func.func @transform_2(%arg0: i32, %arg1: i32) -> (i32, i32, i32, i32) {
    %c0_i32 = arith.constant 0 : i32
    %c0_i32_0 = arith.constant 0 : i32
    %c0_i32_1 = arith.constant 0 : i32
    return %arg0, %arg1, %c0_i32, %c0_i32_0 : i32, i32, i32, i32
  }
}

</mosaic_0001>

<bundles_post_ra>
// kernel: tpu_custom_call.1
= control target key start
LH: loop header
LB: loop body
LE: loop exit
PB: predicated region body
PF: predicated region fallthrough
CT: control target
= control target key end

     0   :  { %7 = vsyncpa [#allocation3], 0  ;;  %s919_s0 = inlined_call_operand.hbm [shape: bf16[2,4,384], index: 0, kind: input, shape index: {}]   ;;  %s920_s1 = inlined_call_operand.hbm [shape: bf16[8,4], index: 1, kind: input, shape index: {}]   ;;  %s921_s2 = inlined_call_operand.hbm [shape: f32[2,1,8,2], index: 2, kind: output, shape index: {}]  }
   0x1   :  { %9 = vsyncpa [#allocation3 + $0x1], 0 }
   0x2   :  { %10 = vsyncpa [#allocation6], 0 }
   0x3   :  { %11 = vsyncpa [#allocation4], 0 }
   0x4   :  { %13 = vsyncpa [#allocation4 + $0x1], 0  ;;  %s702_s9 = smov 0   ;;  %s704_s10 = smov 0  }
   0x5   :  { %s706_s11 = smov 0   ;;  %s708_s12 = smov 0  }
   0x6   :  { %s710_s13 = smov 0   ;;  %s712_s14 = smov 0  }
   0x7 LB: > { %s429_s15 = sadd.s32 4294967295, %s678_s14   ;;  %s430_s16 = sadd.s32 4294967294, %s678_s14   ;;  %s678_s14 = sphi %s712_s14, %s19_s14   ;;  %s674_s13 = sphi %s710_s13, %s946_s13   ;;  %s670_s12 = sphi %s708_s12, %s945_s12   ;;  %s666_s11 = sphi %s706_s11, %s944_s11   ;;  %s662_s10 = sphi %s704_s10, %s943_s10   ;;  %s658_s9 = sphi %s702_s9, %s942_s9  }
   0x8   : > { %p53_p0 = scmp.ne.s32.totalorder %s662_s10, %s658_s9  ;;  %p736_p1 = scmp.eq.s32.totalorder %s429_s15, 0 }
   0x9   : > { %p740_p2 = scmp.eq.s32.totalorder %s429_s15, 1  ;;  %p106_p3 = scmp.eq.s32.totalorder %s430_s16, 1 }
   0xa   : > { %s926_s17 = scalar_select %p736_p1, 1, 0 }
   0xb   : > { %s927_s18 = scalar_select %p740_p2, 1, 0 }
   0xc   : > { %p746_p4 = por %p736_p1, %p53_p0  ;;  %p431_p5 = scmp.ge.s32.totalorder %s678_s14, 1 }
   0xd   : > { %p751_p6 = por %p106_p3, %p53_p0  ;;  %p113_p7 = scmp.lt.s32.totalorder %s678_s14, 3 }
   0xe   : > { %s928_s19 = scalar_select %p746_p4, 1, 0 }
   0xf   : > { %s929_s20 = scalar_select %p751_p6, 1, 0 }
  0x10   : > { %p756_p8 = pnand %p431_p5, %p113_p7  ;;  %s680_s22 = smov [#allocation5]  }
  0x11   : > { %s126_s23 = sshll.u32 %s680_s22, 4  ;;  %s31_s25 = sadd.s32 1, %s674_s13  ;;  %s127_s23 = int_to_ptr.vmem [resolvable:$true] %s126_s23 }
  0x12   : > { %s930_s21 = scalar_select %p756_p8, 1, 0 }
  0x13   : > { %p464_p10 = pneg %p756_p8  ;;  %s40_s26 = sadd.s32 1, %s666_s11 }
  0x14   : > { %p771_p12 = scmp.ge.s32.totalorder %s31_s25, 2  ;;  %s534_s30 = scalar_lea.hbm %s920_s1, 64 }
  0x15   : > { %p765_p11 = pnand %p464_p10, %p736_p1  ;;  %p535_p13 = scmp.ne.s32.totalorder %s920_s1, %s534_s30 }
  0x16   : > { %s932_s27 = scalar_select %p771_p12, 1, 0 }
  0x17   : > { %p536_p0 = pneg %p765_p11  ;;  %p541_p7 = scmp.lt.u32.totalorder %s534_s30, %s920_s1 }
  0x19   : > { %p537_p3 = pnand %p536_p0, %p535_p13 }
  0x1b   : > { %p538_p5 = pneg %p537_p3 }
  0x1d   : > { %p543_p10 = pnand %p541_p7, %p538_p5 }
  0x1f   : > { %546 = shalt.err (!%p543_p10)
}
  0x20   : > { %s547_s7 = scalar_lea.vmem %s127_s23, 64  ;;  %p555_p4 = scmp.lt.s32.totalorder %s127_s23, %s127_s23 }
  0x21   : > { %p548_p9 = scmp.ne.s32.totalorder %s127_s23, %s547_s7  ;;  %p556_p8 = scmp.lt.s32.totalorder %s547_s7, %s547_s7 }
  0x23   : > { %p550_p6 = pnand %p548_p9, %p536_p0  ;;  %p557_p2 = por %p556_p8, %p555_p4 }
  0x25   : > { %p551_p1 = pneg %p550_p6 }
  0x27   : > { %p558_p12 = pnand %p557_p2, %p551_p1 }
  0x29   : > { %561 = shalt.err (!%p558_p12)
}
  0x2a   : > { %467 = dma.hbm_to_vmem [thread:$0]  (!%p765_p11), %s920_s1, 64, %s127_s23, [#allocation6]  }
  0x2b   : > { %p933_p4 = scmp.ne.s32.totalorder %s932_s27, 0  ;;  %p47_p1 = scmp.ne.s32.totalorder %s666_s11, %s662_s10 }
  0x2c   : > { %p48_p2 = scmp.eq.s32.totalorder %s678_s14, 0  ;;  %p477_p6 = scmp.lt.s32.totalorder %s678_s14, 2 }
  0x2d   : > { %s948_s25 = smov (%p933_p4, %s31_s25), 0  ;;  %p934_p12 = scmp.ne.s32.totalorder %s927_s18, 0 }
  0x2e   : > { %s35_s16 = ssub.s32 %s674_s13, %s948_s25  ;;  %p49_p9 = por %p48_p2, %p47_p1 }
  0x2f   : > { %p38_p8 = scmp.eq.s32.totalorder %s35_s16, 0  ;;  %p803_p13 = por %p934_p12, %p47_p1 }
  0x30   : > { %s137_s24 = sand.u32 1, %s666_s11   ;;  %s454_s27 = smul.u32 96, %s674_s13 }
  0x31   : > { %s811_s28 = scalar_select %p38_p8, %s666_s11, %s40_s26  }
  0x32   : > { %s453_s23 = smul.u32 6, %s137_s24  ;;  %p814_p11 = pnand %p477_p6, %p49_p9 }
  0x33   : > { %s821_s18 = scalar_lea.hbm %s919_s0, %s454_s27  ;;  %s138_s5 = scalar_lea.sflag [#allocation3], %s137_s24 }
  0x34   : > { %s141_s4 = scalar_lea.vmem [#allocation2], %s453_s23  ;;  %s562_s6 = scalar_lea.hbm %s821_s18, 96 }
  0x35   : > { %s151_s26 = sshll.u32 %s141_s4, 4  ;;  %p563_p0 = scmp.ne.s32.totalorder %s821_s18, %s562_s6  ;;  %s823_s26 = int_to_ptr.vmem [resolvable:$true] %s151_s26 }
  0x36   : > { %p564_p3 = pneg %p814_p11  ;;  %s567_s15 = scalar_lea.hbm %s919_s0, 192 }
  0x37   : > { %p568_p10 = scmp.lt.u32.totalorder %s821_s18, %s919_s0  ;;  %p569_p4 = scmp.lt.u32.totalorder %s567_s15, %s562_s6 }
  0x38   : > { %p565_p5 = pnand %p564_p3, %p563_p0  ;;  %p571_p2 = scmp.lt.u32.totalorder %s562_s6, %s821_s18 }
  0x39   : > { %p570_p1 = por %p569_p4, %p568_p10 }
  0x3a   : > { %p566_p7 = pneg %p565_p5 }
  0x3b   : > { %p572_p6 = por %p571_p2, %p570_p1 }
  0x3d   : > { %p573_p8 = pnand %p572_p6, %p566_p7 }
  0x3f   : > { %576 = shalt.err (!%p573_p8)
}
  0x40   : > { %s577_s24 = scalar_lea.vmem %s823_s26, 96  ;;  %s681_s23 = smov [#allocation2]  }
  0x41   : > { %p578_p9 = scmp.ne.s32.totalorder %s823_s26, %s577_s24  ;;  %s582_s30 = sshll.u32 %s681_s23, 4  ;;  %s583_s30 = int_to_ptr.vmem [resolvable:$false] %s582_s30 }
  0x42   : > { %s584_s3 = scalar_lea.vmem %s583_s30, 192  ;;  %p585_p5 = scmp.lt.s32.totalorder %s823_s26, %s583_s30 }
  0x43   : > { %p580_p12 = pnand %p578_p9, %p564_p3  ;;  %p586_p10 = scmp.lt.s32.totalorder %s584_s3, %s577_s24 }
  0x45   : > { %p581_p0 = pneg %p580_p12  ;;  %p587_p4 = por %p586_p10, %p585_p5 }
  0x47   : > { %p588_p1 = pnand %p587_p4, %p581_p0 }
  0x49   : > { %591 = shalt.err (!%p588_p1)
}
  0x4a   : > { %471 = dma.hbm_to_vmem [thread:$0]  (!%p814_p11), %s821_s18, 96, %s823_s26, %s138_s5  }
  0x4b   : > { %p937_p7 = scmp.ne.s32.totalorder %s930_s21, 0 }
  0x4c   : > { %s853_s4 = sand.u32 (!%p937_p7), 1, %s662_s10   ;;  %p938_p3 = scmp.ne.s32.totalorder (!%p937_p7), %s928_s19, 0 }
  0x4d   : > { %160 = sbr.rel (%p937_p7) target bundleno = 481 (0x1e1), region = 28  ;;  %s163_s7 = scalar_lea.sflag (!%p937_p7), [#allocation3], %s853_s4 }
  0x4e   : > { %s455_s6 = smul.u32 (!%p937_p7), 6, %s853_s4 }
  0x50   : > { %s166_s8 = scalar_lea.vmem (!%p937_p7), [#allocation2], %s455_s6 }
  0x54   : > { %645 = dma.done.wait (%p938_p3), %s163_s7, 96  }
  0x55   : > { %647 = vsyncadd (%p938_p3), %s163_s7, 4294967200  ;;  %p939_p2 = scmp.ne.s32.totalorder %s926_s17, 0 }
  0x57   : > { %649 = dma.done.wait (%p939_p2), [#allocation6], 64  }
  0x58   : > { %651 = vsyncadd (%p939_p2), [#allocation6], 4294967232  ;;  %v200_v0 = vlaneseq  ;;  %v682_v1 = vmov 1983009808   ;;  %v683_v3 = vmov 0.0   ;;  %v684_v5 = vmov 0  }
  0x59   : > { %v198_v2 = vunpack.c.l.s4 %v682_v1  ;;  %447 = vmatprep.subr.bf16.mxu1 %v683_v3  ;;  %258 = vmatprep.mubr.bf16.mxu0 %v684_v5  ;;  %vm685_vm0 = vmmov 0   ;;  %v194_v8 = vld [vmem:[%s166_s8] sm:$0x3f]  ;;  %vm216_vm1 = vcmask 1041408   ;;  %v193_v15 = vld [vmem:[#allocation5] sm:$0xf] }
  0x5a   : > { %v201_v4 = vshrl.u32 %v200_v0, 7  ;;  %449 = vmatprep.mubr.msk.bf16.mxu1 %vm685_vm0, %v683_v3  ;;  %v196_v10 = vcombine.high %v194_v8, %v194_v8  ;;  %vm212_vm2 = vcmask 31744   ;;  %s437_s17 = sshll.u32 %s853_s4, 3  ;;  %s442_s19 = sshll.u32 %s670_s12, 7  ;;  %vm318_vm3 = vcmask 7168  }
  0x5b   : > { %v199_v6 = vunpack.c.0.s8 %v198_v2  ;;  %s190_s21 = scalar_lea.vmem [#allocation7], %s437_s17  ;;  %vm320_vm4 = vcmask 15360   ;;  %s870_s5 = scalar_lea.hbm %s921_s2, %s442_s19 }
  0x5c   : > { %s337_s29 = sshll.u32 %s190_s21, 4  ;;  %s323_s15 = scalar_lea.sflag [#allocation4], %s853_s4  ;;  %s872_s29 = int_to_ptr.vmem [resolvable:$true] %s337_s29 }
  0x5d   : > { %v202_v7 = vsub.s32 %v199_v6, %v201_v4  ;;  %s592_s16 = scalar_lea.vmem %s872_s29, 128  ;;  %s686_s12 = smov [#allocation7]  }
  0x5e   : > { %p593_p11 = scmp.ne.s32.totalorder %s872_s29, %s592_s16  ;;  %s596_s27 = sshll.u32 %s686_s12, 4  ;;  %s597_s27 = int_to_ptr.vmem [resolvable:$false] %s596_s27 }
  0x5f   : > { %v203_v9 = vrot.slane %v194_v8, %v202_v7  ;;  %v210_v13 = vrot.slane %v196_v10, %v202_v7  ;;  %s598_s24 = scalar_lea.vmem %s597_s27, 256  ;;  %p599_p9 = scmp.lt.s32.totalorder %s872_s29, %s597_s27 }
  0x60   : > { %p594_p6 = pnand %p593_p11, %p803_p13  ;;  %p600_p12 = scmp.lt.s32.totalorder %s598_s24, %s592_s16 }
  0x61   : > { %v211_v11 = vcombine.high %v203_v9, %v203_v9  ;;  %v218_v12 = vsel %vm216_vm1, %v203_v9, 0  ;;  %v224_v14 = vsel %vm216_vm1, %v210_v13, 0 }
  0x62   : > { %448 = vmatpush3.bf16.msra.mxu1 %v224_v14  ;;  %p595_p8 = pneg %p594_p6  ;;  %p601_p0 = por %p600_p12, %p599_p9 }
  0x63   : > { %438 = vmatprep.subr.msk.bf16.mxu0 %vm216_vm1, %v211_v11 }
  0x64   : > { %227 = vmatpush1.bf16.msra.mxu0 %v218_v12  ;;  %p602_p5 = pnand %p601_p0, %p595_p8 }
  0x65   : > { %450 = vmatmul.mubr.msk.bf16.vlgmr.msra.gmra.mrb[0].mxu1 %vm212_vm2, %v193_v15 }
  0x67   : > { %439 = vmatmul.mubr.msk.bf16.vlgmr.msra.gmra.mrb[0].mxu0 %vm212_vm2, %v193_v15 }
 0x138   : > { %v301_v17 = vpop.f32.mrb[0].mxu1 }
 0x139   : > { %v451_v20 = vpop.f32.mrb[1].mxu1  ;;  %v313_v21 = vmul.f32 %v301_v17, %v301_v17 }
 0x13a   : > { %v260_v16 = vpop.f32.mrb[0].mxu0  ;;  %v304_v25 = vpop.f32.mrb[2].mxu1 }
 0x13b   : > { %v311_v18 = vmul.f32 %v260_v16, %v260_v16  ;;  %v262_v19 = vpop.f32.mrb[1].mxu0  ;;  %v452_v27 = vpop.f32.mrb[3].mxu1 }
 0x13c   : > { %v307_v22 = vadd.f32 %v262_v19, %v260_v16  ;;  %v312_v23 = vmul.f32 %v262_v19, %v262_v19  ;;  %v264_v24 = vpop.f32.mrb[2].mxu0 }
 0x13d   : > { %v265_v26 = vpop.f32.mrb[3].mxu0 }
 0x13e   : > { %v308_v28 = vadd.f32 %v307_v22, %v301_v17  ;;  %v314_v29 = vadd.f32 %v312_v23, %v311_v18 }
 0x140   : > { %309 = vadd.xlane.f32.xlu0 %v308_v28  ;;  %v315_v30 = vadd.f32 %v314_v29, %v313_v21 }
 0x144   : > { %316 = vadd.xlane.f32.xlu0 %v315_v30 }
 0x1cd   : > { %v310_v31 = vpop.xlane.xlu0 %309 }
 0x1d1   : > { %v317_v32 = vpop.xlane.xlu0 %316 }
 0x1d2   : > { %v319_v33 = vsel %vm318_vm3, %v310_v31, %v317_v32 }
 0x1d3   : > { %321 = vst.msk [vmem:[%s190_s21] sm:$0xff] %vm320_vm4, %v319_v33 }
 0x1d4   : > { %605 = shalt.err (!%p602_p5)
}
 0x1d5   : > { %s606_s23 = scalar_lea.hbm %s870_s5, 128  ;;  %s610_s4 = scalar_lea.hbm %s921_s2, 256 }
 0x1d6   : > { %p607_p10 = scmp.ne.s32.totalorder %s870_s5, %s606_s23  ;;  %p611_p7 = scmp.lt.u32.totalorder %s870_s5, %s921_s2 }
 0x1d7   : > { %p612_p3 = scmp.lt.u32.totalorder %s610_s4, %s606_s23  ;;  %p614_p11 = scmp.lt.u32.totalorder %s606_s23, %s870_s5 }
 0x1d8   : > { %p608_p4 = pnand %p607_p10, %p803_p13 }
 0x1d9   : > { %p613_p2 = por %p612_p3, %p611_p7 }
 0x1da   : > { %p609_p1 = pneg %p608_p4 }
 0x1db   : > { %p615_p6 = por %p614_p11, %p613_p2 }
 0x1dd   : > { %p616_p8 = pnand %p615_p6, %p609_p1 }
 0x1df   : > { %619 = shalt.err (!%p616_p8)
}
 0x1e0   : > { %462 = dma.vmem_to_hbm [thread:$0]  (%p803_p13), %s872_s29, 128, %s870_s5, %s323_s15  }
 0x1e1 PF: > { %s349_s8 = sand.u32 1, %s658_s9   ;;  %p940_p9 = scmp.ne.s32.totalorder %s929_s20, 0 }
 0x1e2   : > { %p941_p12 = scmp.ge.s32.totalorder %s678_s14, 2  ;;  %s350_s17 = scalar_lea.sflag [#allocation4], %s349_s8 }
 0x1e4   : > { %p473_p0 = pnand %p941_p12, %p940_p9 }
 0x1e6   : > { %653 = dma.done.wait (!%p473_p0), %s350_s17, 128  }
 0x1e7   : > { %655 = vsyncadd (!%p473_p0), %s350_s17, 4294967168  ;;  %s19_s14 = sadd.s32 1, %s678_s14   ;;  %s942_s9 = smov %s662_s10 }
 0x1e8   : > { %p16_p5 = scmp.ge.s32.totalorder %s19_s14, 4   ;;  %s943_s10 = smov %s666_s11 }
 0x1e9   : > { %s944_s11 = smov %s811_s28  ;;  %s945_s12 = smov %s674_s13 }
 0x1ea   : > { %s946_s13 = smov %s948_s25  ;;  %18 = sbr.rel (!%p16_p5) target bundleno = 7 (0x7), region = 77 }
 0x1f1   :  { %355 = vsyncpa [#allocation3], 1 }
 0x1f2   :  { %357 = vsyncpa [#allocation3 + $0x1], 1 }
 0x1f3   :  { %358 = vsyncpa [#allocation6], 1 }
 0x1f4   :  { %359 = vsyncpa [#allocation4], 1 }
 0x1f5   :  { %361 = vsyncpa [#allocation4 + $0x1], 1 }

</bundles_post_ra>
